<compile_context>
chip_gen: v7x
topology: tpu7x:2x2x1
jax: 0.10.0
libtpu: 0.0.40
codegen_flags: <defaults>
</compile_context>

<pallas_src>
import jax
import jax.numpy as jnp
import numpy as np
from jax.experimental import pallas as pl
from jax.experimental.pallas import tpu as pltpu

# CLIP normalization constants (as in the original repo).
CLIP_PIXEL_MEAN = (0.48145466, 0.4578275, 0.40821073)
CLIP_PIXEL_STD = (0.26862954, 0.26130258, 0.27577711)


def _round_up(x, m):
    return ((x + m - 1) // m) * m


def _vmem_capacity_bytes():
    """Best-effort VMEM capacity query; conservative (v7x-sized) fallback."""
    try:
        info = pltpu.get_tpu_info()
        cap = getattr(info, "vmem_capacity_bytes", None)
        if cap:
            return int(cap)
    except Exception:
        pass
    return 64 << 20


def _perpixel_clip_kernel(img_ref, w_ref, bias_ref, text_ref, out_ref, acc_ref):
    """Fused visual projection (K-tiled) -> L2 norm -> similarity logits.

    img_ref : (tm, tk)       bf16  flattened image tile (preprocess folded away)
    w_ref   : (tk, D_pad)    bf16  fused visual weight tile  W' = W / std
    bias_ref: (1, D_pad)     f32   fused preprocess bias     b = -(mean/std) @ W
    text_ref: (D_pad, N_pad) bf16  text features, pre-transposed, pre-scaled x100
    out_ref : (tm, N_pad)    f32   similarity logits
    acc_ref : (tm, D_pad)    f32   VMEM accumulator over the K (CHW) grid axis
    """
    k = pl.program_id(1)

    @pl.when(k == 0)
    def _():
        # Initialize the accumulator with the folded preprocess bias; the k==0
        # write happens anyway, and this removes an add from the epilogue.
        acc_ref[...] = jnp.broadcast_to(bias_ref[...], acc_ref.shape)

    # MXU bf16 matmul, f32 accumulation in VMEM scratch.
    acc_ref[...] += jnp.dot(img_ref[...], w_ref[...],
                            preferred_element_type=jnp.float32)

    @pl.when(k == pl.num_programs(1) - 1)
    def _():
        feats = acc_ref[...]                                         # (tm, D) f32
        # L2 normalize along feature dim (no eps, matching PyTorch `/ norm`).
        inv_norm = jax.lax.rsqrt(jnp.sum(feats * feats, axis=-1, keepdims=True))
        feats_bf16 = (feats * inv_norm).astype(jnp.bfloat16)
        # Temperature (100) already folded into text_ref; text pre-transposed,
        # so the epilogue is a single bf16 MXU matmul with f32 output.
        out_ref[...] = jnp.dot(feats_bf16, text_ref[...],
                               preferred_element_type=jnp.float32)


def _choose_tiles(B, CHW, D, N, vmem_cap):
    """Generation-aware tile / padding selection."""
    big_vmem = vmem_cap >= (100 << 20)                  # v5e/v6e (128 MiB) vs v7x (64 MiB)
    vmem_limit = (100 << 20) if big_vmem else (56 << 20)
    buf_budget = (64 << 20) if big_vmem else (26 << 20)

    D_pad = _round_up(D, 128)
    N_pad = _round_up(N, 128)

    # M tile: multiple of 16 (bf16 sublane packing).  For B <= 128 use a single
    # M block so the fused weight is streamed from HBM exactly once; for larger
    # B use tm=128 so there are >=2 parallel M blocks (megacore on v7x).
    # TODO(synk): for tiny batches on v7x one TensorCore idles; a K-split with
    # partial-accumulator combine would be needed to use both cores.
    if B <= 128:
        tm = _round_up(max(B, 1), 16)
    else:
        tm = 128
    M_pad = _round_up(B, tm)

    # Largest K tile whose (double-buffered) pipeline buffers fit the budget.
    tk = 128
    for cand in (4096, 2048, 1024, 512, 256, 128):
        img_b = 2 * tm * cand * 2            # bf16, double-buffered
        w_b = 2 * cand * D_pad * 2           # bf16, double-buffered
        text_b = 2 * D_pad * N_pad * 2       # bf16, resident (counted x2)
        out_b = 2 * tm * N_pad * 4           # f32, double-buffered
        acc_b = tm * D_pad * 4               # f32 scratch
        bias_b = D_pad * 4
        if img_b + w_b + text_b + out_b + acc_b + bias_b <= buf_budget:
            tk = cand
            break
    tk = min(tk, _round_up(CHW, 128))        # don't tile wider than the data
    CHW_pad = _round_up(CHW, tk)
    return tm, M_pad, tk, CHW_pad, D_pad, N_pad, vmem_limit


def perpixel_clip_adapter_forward(image_nchw, text_features, w_visual):
    """JAX wrapper reproducing PerPixelClipAdapter.forward.

    image_nchw   : (B, 3, H, W) float32, raw pixels in [0, 255]
    text_features: (N, D) float32 (already produced by the "prompt learner")
    w_visual     : (3*H*W, D) float32 synthetic visual encoder weight
    returns      : (B, 2, 2, N) float32 logits
    """
    B, C, H, W = image_nchw.shape
    N, D = text_features.shape
    CHW = C * H * W
    assert w_visual.shape == (CHW, D)

    tm, M_pad, tk, CHW_pad, D_pad, N_pad, vmem_limit = _choose_tiles(
        B, CHW, D, N, _vmem_capacity_bytes())

    # ---- fold the preprocess into the weight (wrapper-side, one time) ----
    mean = jnp.asarray(CLIP_PIXEL_MEAN, jnp.float32) * 255.0          # (C,)
    std = jnp.asarray(CLIP_PIXEL_STD, jnp.float32) * 255.0            # (C,)
    mean_flat = jnp.repeat(mean, H * W)                               # (CHW,)
    std_flat = jnp.repeat(std, H * W)                                 # (CHW,)
    bias = (-(mean_flat / std_flat) @ w_visual).reshape(1, D)         # f32 (1, D)
    w_fused = w_visual / std_flat[:, None]                            # f32 (CHW, D)

    # ---- lane/sublane-dense zero padding (exact: zeros contribute nothing) --
    bias_p = jnp.pad(bias, ((0, 0), (0, D_pad - D)))                  # f32 (1, D_pad)
    w_p = jnp.pad(w_fused, ((0, CHW_pad - CHW), (0, D_pad - D)))
    w_p = w_p.astype(jnp.bfloat16)                                    # (CHW_pad, D_pad)

    text_t = (100.0 * text_features).T                                # (D, N) f32
    text_p = jnp.pad(text_t, ((0, D_pad - D), (0, N_pad - N)))
    text_p = text_p.astype(jnp.bfloat16)                              # (D_pad, N_pad)

    img_flat = image_nchw.reshape(B, CHW)
    if M_pad != B or CHW_pad != CHW:
        img_flat = jnp.pad(img_flat, ((0, M_pad - B), (0, CHW_pad - CHW)))
    img_p = img_flat.astype(jnp.bfloat16)                             # (M_pad, CHW_pad)

    grid = (M_pad // tm, CHW_pad // tk)

    logits_pad = pl.pallas_call(
        _perpixel_clip_kernel,
        out_shape=jax.ShapeDtypeStruct((M_pad, N_pad), jnp.float32),
        grid_spec=pltpu.PrefetchScalarGridSpec(
            num_scalar_prefetch=0,
            grid=grid,
            in_specs=[
                pl.BlockSpec((tm, tk), lambda i, k: (i, k)),          # image tile
                pl.BlockSpec((tk, D_pad), lambda i, k: (k, 0)),       # fused weight
                pl.BlockSpec((1, D_pad), lambda i, k: (0, 0)),        # fused bias
                pl.BlockSpec((D_pad, N_pad), lambda i, k: (0, 0)),    # text (bf16)
            ],
            out_specs=pl.BlockSpec((tm, N_pad), lambda i, k: (i, 0)),
            scratch_shapes=[pltpu.VMEM((tm, D_pad), jnp.float32)],
        ),
        compiler_params=pltpu.CompilerParams(
            dimension_semantics=("parallel", "arbitrary"),
            vmem_limit_bytes=vmem_limit,
        ),
    )(img_p, w_p, bias_p, text_p)

    logits = logits_pad[:B, :N]

    # per_pixel=False branch: global feature expanded to a 2x2 pseudo-grid,
    # so logits are simply broadcast over the (2, 2) spatial dims.
    return jnp.broadcast_to(logits[:, None, None, :], (B, 2, 2, N))


def _synthetic_prompt_learner(key, n_text, feat_dim):
    """Deterministic stand-in for prompt_learner + CLIP text encoder."""
    # TODO(synk): real CLIP text transformer not reproducible here; emit
    # unit-norm synthetic text features instead.
    tf = jax.random.normal(key, (n_text, feat_dim), jnp.float32)
    return tf / jnp.linalg.norm(tf, axis=-1, keepdims=True)


def _reference_forward(image, text_features, w_visual):
    """Pure-JAX f32 reference with the exact PyTorch-module semantics."""
    B, C, H, W = image.shape
    mean = jnp.asarray(CLIP_PIXEL_MEAN, jnp.float32).reshape(1, C, 1, 1) * 255.0
    std = jnp.asarray(CLIP_PIXEL_STD, jnp.float32).reshape(1, C, 1, 1) * 255.0
    x = (image - mean) / std
    feats = jnp.dot(x.reshape(B, -1), w_visual,
                    precision=jax.lax.Precision.HIGHEST)
    feats = feats / jnp.linalg.norm(feats, axis=-1, keepdims=True)
    logits = 100.0 * jnp.dot(feats, text_features.T,
                             precision=jax.lax.Precision.HIGHEST)
    return jnp.broadcast_to(logits[:, None, None, :],
                            (B, 2, 2, text_features.shape[0]))


if __name__ == "__main__":
    # Small, module-consistent shapes.
    B, C, H, W = 2, 3, 16, 16     # RGB image, NCHW
    D = 32                        # CLIP feature dim (synthetic)
    N_TEXT = 8                    # number of text prompts / nouns

    key = jax.random.PRNGKey(0)
    k_img, k_txt, k_vis = jax.random.split(key, 3)

    # Raw pixels in [0, 255] as fed to the adapter.
    image = jax.random.uniform(k_img, (B, C, H, W), jnp.float32, 0.0, 255.0)
    text_features = _synthetic_prompt_learner(k_txt, N_TEXT, D)
    w_visual = jax.random.normal(k_vis, (C * H * W, D), jnp.float32) * 0.02

    logits = perpixel_clip_adapter_forward(image, text_features, w_visual)
    jax.block_until_ready(logits)

    assert logits.shape == (B, 2, 2, N_TEXT)
    assert logits.dtype == jnp.float32

    ref = _reference_forward(image, text_features, w_visual)
    np.testing.assert_allclose(np.asarray(logits), np.asarray(ref),
                               rtol=2e-2, atol=0.75)

    print("KERNEL_OK")
</pallas_src>

<mosaic_0001>
module attributes {stable_mosaic.version = 11 : i64} {
  func.func @_perpixel_clip_kernel(%arg0: i32, %arg1: i32, %arg2: memref<16x768xbf16, #tpu.memory_space<vmem>>, %arg3: memref<768x128xbf16, #tpu.memory_space<vmem>>, %arg4: memref<1x128xf32, #tpu.memory_space<vmem>>, %arg5: memref<128x128xbf16, #tpu.memory_space<vmem>>, %arg6: memref<16x128xf32, #tpu.memory_space<vmem>>, %arg7: memref<16x128xf32, #tpu.memory_space<vmem>>) attributes {dimension_semantics = [#tpu.dimension_semantics<parallel>, #tpu.dimension_semantics<arbitrary>], iteration_bounds = array<i64: 1, 1>, scalar_prefetch = 0 : i64, scratch_operands = 1 : i64, tpu.core_type = #tpu.core_type<tc>, window_params = [{transform_indices = @transform_0, window_bounds = array<i64: 16, 768>}, {transform_indices = @transform_1, window_bounds = array<i64: 768, 128>}, {pipeline_mode = #tpu.pipeline_mode<synchronous>, transform_indices = @transform_2, window_bounds = array<i64: 1, 128>}, {pipeline_mode = #tpu.pipeline_mode<synchronous>, transform_indices = @transform_3, window_bounds = array<i64: 128, 128>}, {transform_indices = @transform_4, window_bounds = array<i64: 16, 128>}]} {
    %c0_i32 = arith.constant 0 : i32
    %0 = arith.cmpi eq, %arg1, %c0_i32 : i32
    %1 = arith.extui %0 : i1 to i32
    %c0_i32_0 = arith.constant 0 : i32
    %2 = arith.cmpi ne, %1, %c0_i32_0 : i32
    scf.if %2 {
      %c0_10 = arith.constant 0 : index
      %c0_11 = arith.constant 0 : index
      %12 = vector.load %arg4[%c0_10, %c0_11] : memref<1x128xf32, #tpu.memory_space<vmem>>, vector<1x128xf32>
      %13 = vector.shape_cast %12 : vector<1x128xf32> to vector<1x128xf32>
      %14 = vector.broadcast %13 : vector<1x128xf32> to vector<16x128xf32>
      %c0_12 = arith.constant 0 : index
      %c0_13 = arith.constant 0 : index
      %15 = vector.load %arg7[%c0_12, %c0_13] : memref<16x128xf32, #tpu.memory_space<vmem>>, vector<16x128xf32>
      tpu.vector_store %arg7[%c0_12, %c0_13], %14 {strides = array<i32>} : memref<16x128xf32, #tpu.memory_space<vmem>>, vector<16x128xf32>,
    } else {
    }
    %c0 = arith.constant 0 : index
    %c0_1 = arith.constant 0 : index
    %3 = vector.load %arg7[%c0, %c0_1] : memref<16x128xf32, #tpu.memory_space<vmem>>, vector<16x128xf32>
    %c0_2 = arith.constant 0 : index
    %c0_3 = arith.constant 0 : index
    %4 = vector.load %arg2[%c0_2, %c0_3] : memref<16x768xbf16, #tpu.memory_space<vmem>>, vector<16x768xbf16>
    %c0_4 = arith.constant 0 : index
    %c0_5 = arith.constant 0 : index
    %5 = vector.load %arg3[%c0_4, %c0_5] : memref<768x128xbf16, #tpu.memory_space<vmem>>, vector<768x128xbf16>
    %cst = arith.constant dense<0.000000e+00> : vector<16x128xf32>
    %6 = tpu.matmul %4, %5, %cst {dimension_numbers = #tpu.dot_dimension_numbers<[1], [0], [0], [1], [0, 0, 1, 1], [], []>} : vector<16x768xbf16>, vector<768x128xbf16>, vector<16x128xf32> -> vector<16x128xf32>
    %7 = arith.addf %3, %6 : vector<16x128xf32>
    %c0_6 = arith.constant 0 : index
    %c0_7 = arith.constant 0 : index
    %8 = vector.load %arg7[%c0_6, %c0_7] : memref<16x128xf32, #tpu.memory_space<vmem>>, vector<16x128xf32>
    tpu.vector_store %arg7[%c0_6, %c0_7], %7 {strides = array<i32>} : memref<16x128xf32, #tpu.memory_space<vmem>>, vector<16x128xf32>,
    %c0_i32_8 = arith.constant 0 : i32
    %9 = arith.cmpi eq, %arg1, %c0_i32_8 : i32
    %10 = arith.extui %9 : i1 to i32
    %c0_i32_9 = arith.constant 0 : i32
    %11 = arith.cmpi ne, %10, %c0_i32_9 : i32
    scf.if %11 {
      %c0_10 = arith.constant 0 : index
      %c0_11 = arith.constant 0 : index
      %12 = vector.load %arg7[%c0_10, %c0_11] : memref<16x128xf32, #tpu.memory_space<vmem>>, vector<16x128xf32>
      %13 = arith.mulf %12, %12 : vector<16x128xf32>
      %cst_12 = arith.constant dense<0.000000e+00> : vector<16xf32>
      %14 = vector.multi_reduction <add>, %13, %cst_12 [1] : vector<16x128xf32> to vector<16xf32>
      %15 = vector.shape_cast %14 : vector<16xf32> to vector<16x1xf32>
      %16 = math.rsqrt %15 : vector<16x1xf32>
      %17 = vector.broadcast %16 : vector<16x1xf32> to vector<16x128xf32>
      %18 = arith.mulf %12, %17 : vector<16x128xf32>
      %19 = arith.truncf %18 : vector<16x128xf32> to vector<16x128xbf16>
      %c0_13 = arith.constant 0 : index
      %c0_14 = arith.constant 0 : index
      %20 = vector.load %arg5[%c0_13, %c0_14] : memref<128x128xbf16, #tpu.memory_space<vmem>>, vector<128x128xbf16>
      %cst_15 = arith.constant dense<0.000000e+00> : vector<16x128xf32>
      %21 = tpu.matmul %19, %20, %cst_15 {dimension_numbers = #tpu.dot_dimension_numbers<[1], [0], [0], [1], [0, 0, 1, 1], [], []>} : vector<16x128xbf16>, vector<128x128xbf16>, vector<16x128xf32> -> vector<16x128xf32>
      %c0_16 = arith.constant 0 : index
      %c0_17 = arith.constant 0 : index
      %22 = vector.load %arg6[%c0_16, %c0_17] : memref<16x128xf32, #tpu.memory_space<vmem>>, vector<16x128xf32>
      tpu.vector_store %arg6[%c0_16, %c0_17], %21 {strides = array<i32>} : memref<16x128xf32, #tpu.memory_space<vmem>>, vector<16x128xf32>,
    } else {
    }
    return
  }
  func.func @transform_0(%arg0: i32, %arg1: i32) -> (i32, i32) {
    %c0_i32 = arith.constant 0 : i32
    return %arg0, %arg1 : i32, i32
  }
  func.func @transform_1(%arg0: i32, %arg1: i32) -> (i32, i32) {
    %c0_i32 = arith.constant 0 : i32
    %c0_i32_0 = arith.constant 0 : i32
    return %arg1, %c0_i32 : i32, i32
  }
  func.func @transform_2(%arg0: i32, %arg1: i32) -> (i32, i32) {
    %c0_i32 = arith.constant 0 : i32
    %c0_i32_0 = arith.constant 0 : i32
    %c0_i32_1 = arith.constant 0 : i32
    return %c0_i32, %c0_i32_0 : i32, i32
  }
  func.func @transform_3(%arg0: i32, %arg1: i32) -> (i32, i32) {
    %c0_i32 = arith.constant 0 : i32
    %c0_i32_0 = arith.constant 0 : i32
    %c0_i32_1 = arith.constant 0 : i32
    return %c0_i32, %c0_i32_0 : i32, i32
  }
  func.func @transform_4(%arg0: i32, %arg1: i32) -> (i32, i32) {
    %c0_i32 = arith.constant 0 : i32
    %c0_i32_0 = arith.constant 0 : i32
    return %arg0, %c0_i32 : i32, i32
  }
}

</mosaic_0001>

<bundles_post_ra>
// kernel: tpu_custom_call.1
= control target key start
LH: loop header
LB: loop body
LE: loop exit
PB: predicated region body
PF: predicated region fallthrough
CT: control target
= control target key end

     0   :  { %9 = vsyncpa [#allocation4], 0  ;;  %s1190_s0 = inlined_call_operand.hbm [shape: bf16[16,768], index: 0, kind: input, shape index: {}]   ;;  %s1191_s1 = inlined_call_operand.hbm [shape: bf16[768,128], index: 1, kind: input, shape index: {}]   ;;  %s1192_s2 = inlined_call_operand.vmem [shape: f32[1,128], index: 2, kind: input, shape index: {}]   ;;  %s1193_s3 = inlined_call_operand.hbm [shape: bf16[128,128], index: 3, kind: input, shape index: {}]   ;;  %s1194_s4 = inlined_call_operand.hbm [shape: f32[16,128], index: 4, kind: output, shape index: {}]  }
   0x1   :  { %10 = vsyncpa [#allocation7], 0 }
   0x2   :  { %11 = vsyncpa [#allocation5], 0  ;;  %s1096_s15 = smov [#allocation6]   ;;  %s1002_s19 = scalar_lea.hbm %s1191_s1, 6144 }
   0x3   :  { %s29_s16 = sshll.u32 %s1096_s15, 4  ;;  %p1003_p0 = scmp.ne.s32.totalorder %s1191_s1, %s1002_s19  ;;  %s30_s16 = int_to_ptr.vmem [resolvable:$true] %s29_s16 }
   0x4   :  { %p1006_p1 = scmp.lt.u32.totalorder %s1002_s19, %s1191_s1 }
   0x6   :  { %p1008_p2 = pnand %p1006_p1, %p1003_p0 }
   0x8   :  { %1011 = shalt.err (!%p1008_p2)
}
   0x9   :  { %s1012_s24 = scalar_lea.vmem %s30_s16, 6144  ;;  %p1017_p4 = scmp.lt.s32.totalorder %s30_s16, %s30_s16 }
   0xa   :  { %p1013_p3 = scmp.ne.s32.totalorder %s30_s16, %s1012_s24  ;;  %p1018_p5 = scmp.lt.s32.totalorder %s1012_s24, %s1012_s24 }
   0xc   :  { %p1019_p6 = por %p1018_p5, %p1017_p4 }
   0xe   :  { %p1020_p7 = pnand %p1019_p6, %p1013_p3 }
  0x10   :  { %1023 = shalt.err (!%p1020_p7)
}
  0x11   :  { %s1097_s25 = smov 64   ;;  %s1098_s26 = smov 4  }
  0x12   :  { %35 = dma.hbm_to_vmem [thread:$0]  %s1191_s1, 6144, %s30_s16, [#allocation7], %s1097_s25, %s1097_s25, %s1098_s26  }
  0x13   :  { %s1099_s29 = smov [#allocation3]   ;;  %s1024_s7 = scalar_lea.hbm %s1190_s0, 768 }
  0x14   :  { %s17_s30 = sshll.u32 %s1099_s29, 4  ;;  %p1025_p8 = scmp.ne.s32.totalorder %s1190_s0, %s1024_s7  ;;  %s18_s30 = int_to_ptr.vmem [resolvable:$true] %s17_s30 }
  0x15   :  { %p1028_p9 = scmp.lt.u32.totalorder %s1024_s7, %s1190_s0 }
  0x17   :  { %p1030_p10 = pnand %p1028_p9, %p1025_p8 }
  0x19   :  { %1033 = shalt.err (!%p1030_p10)
}
  0x1a   :  { %s1034_s12 = scalar_lea.vmem %s18_s30, 768  ;;  %p1039_p12 = scmp.lt.s32.totalorder %s18_s30, %s18_s30 }
  0x1b   :  { %p1035_p11 = scmp.ne.s32.totalorder %s18_s30, %s1034_s12  ;;  %p1040_p13 = scmp.lt.s32.totalorder %s1034_s12, %s1034_s12 }
  0x1d   :  { %p1041_p0 = por %p1040_p13, %p1039_p12 }
  0x1f   :  { %p1042_p1 = pnand %p1041_p0, %p1035_p11 }
  0x21   :  { %1045 = shalt.err (!%p1042_p1)
}
  0x22   :  { %s1100_s1 = smov 384   ;;  %s1101_s13 = smov 24  }
  0x23   :  { %23 = dma.hbm_to_vmem [thread:$0]  %s1190_s0, 768, %s18_s30, [#allocation4], %s1100_s1, %s1100_s1, %s1101_s13  }
  0x24   :  { %s1102_s16 = smov [#allocation8]   ;;  %s1046_s20 = scalar_lea.hbm %s1193_s3, 1024 }
  0x25   :  { %s43_s17 = sshll.u32 %s1102_s16, 4  ;;  %p1047_p2 = scmp.ne.s32.totalorder %s1193_s3, %s1046_s20  ;;  %s44_s17 = int_to_ptr.vmem [resolvable:$true] %s43_s17 }
  0x26   :  { %p1050_p3 = scmp.lt.u32.totalorder %s1046_s20, %s1193_s3 }
  0x28   :  { %p1052_p4 = pnand %p1050_p3, %p1047_p2 }
  0x2a   :  { %1055 = shalt.err (!%p1052_p4)
}
  0x2b   :  { %s1056_s27 = scalar_lea.vmem %s44_s17, 1024  ;;  %p1061_p6 = scmp.lt.s32.totalorder %s44_s17, %s44_s17 }
  0x2c   :  { %p1057_p5 = scmp.ne.s32.totalorder %s44_s17, %s1056_s27  ;;  %p1062_p7 = scmp.lt.s32.totalorder %s1056_s27, %s1056_s27 }
  0x2e   :  { %p1063_p8 = por %p1062_p7, %p1061_p6 }
  0x30   :  { %p1064_p9 = pnand %p1063_p8, %p1057_p5 }
  0x32   :  { %1067 = shalt.err (!%p1064_p9)
}
  0x33   :  { %49 = dma.hbm_to_vmem [thread:$0]  %s1193_s3, 1024, %s44_s17, [#allocation7], %s1097_s25, %s1097_s25, %s1098_s26  }
  0x34   :  { %1090 = dma.done.wait [#allocation4], 768  }
  0x35   :  { %1091 = vsyncadd [#allocation4], 4294966528 }
  0x36   :  { %1092 = dma.done.wait [#allocation7], 7168  }
  0x37   :  { %1093 = vsyncadd [#allocation7], 4294960128  ;;  %v933_v0 = vld [vmem:[#allocation6 + $0x40] sm:$0xff]   ;;  %v937_v4 = vld [vmem:[#allocation6 + $0x48] sm:$0xff]   ;;  %v1103_v55 = vmov 0.0   ;;  %vm1104_vm0 = vmmov 0  }
  0x38   :  { %v934_v1 = vld [vmem:[#allocation6 + $0xc0] sm:$0xff]   ;;  %826 = vmatprep.subr.bf16.mxu0 %v933_v0  ;;  %v938_v5 = vld [vmem:[#allocation6 + $0xc8] sm:$0xff]   ;;  %v941_v8 = vld [vmem:[#allocation6 + $0x50] sm:$0xff]  }
  0x39   :  { %v935_v2 = vld [vmem:[#allocation6] sm:$0xff]   ;;  %848 = vmatprep.subr.bf16.mxu1 %v934_v1  ;;  %v939_v6 = vld [vmem:[#allocation6 + $0x8] sm:$0xff]   ;;  %v942_v9 = vld [vmem:[#allocation6 + $0xd0] sm:$0xff]  }
  0x3a   :  { %v936_v3 = vld [vmem:[#allocation6 + $0x80] sm:$0xff]   ;;  %827 = vmatpush3.bf16.msra.mxu0 %v935_v2  ;;  %v940_v7 = vld [vmem:[#allocation6 + $0x88] sm:$0xff]   ;;  %v943_v10 = vld [vmem:[#allocation6 + $0x10] sm:$0xff]  }
  0x3b   :  { %849 = vmatpush3.bf16.msra.mxu1 %v936_v3  ;;  %828 = vmatprep.subr.bf16.mxu0 %v937_v4  ;;  %v944_v11 = vld [vmem:[#allocation6 + $0x90] sm:$0xff]   ;;  %v945_v12 = vld [vmem:[#allocation6 + $0x58] sm:$0xff]   ;;  %v949_v16 = vld [vmem:[#allocation6 + $0x60] sm:$0xff]  }
  0x3c   :  { %850 = vmatprep.subr.bf16.mxu1 %v938_v5  ;;  %v946_v13 = vld [vmem:[#allocation6 + $0xd8] sm:$0xff]   ;;  %v950_v17 = vld [vmem:[#allocation6 + $0xe0] sm:$0xff]   ;;  %v953_v20 = vld [vmem:[#allocation6 + $0x68] sm:$0xff]  }
  0x3d   :  { %v947_v14 = vld [vmem:[#allocation6 + $0x18] sm:$0xff]   ;;  %v951_v18 = vld [vmem:[#allocation6 + $0x20] sm:$0xff]   ;;  %v954_v21 = vld [vmem:[#allocation6 + $0xe8] sm:$0xff]  }
  0x3e   :  { %829 = vmatpush3.bf16.msra.mxu0 %v939_v6  ;;  %v948_v15 = vld [vmem:[#allocation6 + $0x98] sm:$0xff]   ;;  %v952_v19 = vld [vmem:[#allocation6 + $0xa0] sm:$0xff]   ;;  %v955_v22 = vld [vmem:[#allocation6 + $0x28] sm:$0xff]  }
  0x3f   :  { %851 = vmatpush3.bf16.msra.mxu1 %v940_v7  ;;  %830 = vmatprep.subr.bf16.mxu0 %v941_v8  ;;  %v956_v23 = vld [vmem:[#allocation6 + $0xa8] sm:$0xff]   ;;  %v957_v24 = vld [vmem:[#allocation6 + $0x70] sm:$0xff]   ;;  %v961_v28 = vld [vmem:[#allocation6 + $0x78] sm:$0xff]  }
  0x40   :  { %852 = vmatprep.subr.bf16.mxu1 %v942_v9  ;;  %v958_v25 = vld [vmem:[#allocation6 + $0xf0] sm:$0xff]   ;;  %v962_v29 = vld [vmem:[#allocation6 + $0xf8] sm:$0xff]   ;;  %v971_v36 = vld [vmem:[#allocation6 + $0x140] sm:$0xff]  }
  0x41   :  { %v959_v26 = vld [vmem:[#allocation6 + $0x30] sm:$0xff]   ;;  %v963_v30 = vld [vmem:[#allocation6 + $0x38] sm:$0xff]   ;;  %v972_v37 = vld [vmem:[#allocation6 + $0x100] sm:$0xff]  }
  0x42   :  { %831 = vmatpush3.bf16.msra.mxu0 %v943_v10  ;;  %v960_v27 = vld [vmem:[#allocation6 + $0xb0] sm:$0xff]   ;;  %v964_v31 = vld [vmem:[#allocation6 + $0xb8] sm:$0xff]   ;;  %v973_v38 = vld [vmem:[#allocation6 + $0x148] sm:$0xff]  }
  0x43   :  { %853 = vmatpush3.bf16.msra.mxu1 %v944_v11  ;;  %832 = vmatprep.subr.bf16.mxu0 %v945_v12  ;;  %v965_v32 = vld [vmem:[#allocation3] ss:$24 sps:$4 sm:$0xff]   ;;  %v967_v33 = vld [vmem:[#allocation3 + $0x4] ss:$24 sps:$4 sm:$0xff]   ;;  %v977_v42 = vld [vmem:[#allocation6 + $0x158] sm:$0xff]  }
  0x44   :  { %854 = vmatprep.subr.bf16.mxu1 %v946_v13  ;;  %v968_v34 = vld [vmem:[#allocation3 + $0x8] ss:$24 sps:$4 sm:$0xff]   ;;  %v970_v35 = vld [vmem:[#allocation3 + $0xc] ss:$24 sps:$4 sm:$0xff]   ;;  %527 = vmatprep.mubr.bf16.mxu0 %v967_v33  ;;  %v974_v39 = vld [vmem:[#allocation6 + $0x108] sm:$0xff]  }
  0x45   :  { %568 = vmatprep.mubr.bf16.mxu1 %v970_v35  ;;  %v975_v40 = vld [vmem:[#allocation6 + $0x150] sm:$0xff]   ;;  %v978_v43 = vld [vmem:[#allocation6 + $0x118] sm:$0xff]   ;;  %v979_v44 = vld [vmem:[#allocation6 + $0x160] sm:$0xff]  }
  0x46   :  { %833 = vmatpush3.bf16.msra.mxu0 %v947_v14  ;;  %v976_v41 = vld [vmem:[#allocation6 + $0x110] sm:$0xff]   ;;  %v980_v45 = vld [vmem:[#allocation6 + $0x120] sm:$0xff]   ;;  %v981_v46 = vld [vmem:[#allocation6 + $0x168] sm:$0xff]  }
  0x47   :  { %855 = vmatpush3.bf16.msra.mxu1 %v948_v15  ;;  %834 = vmatprep.subr.bf16.mxu0 %v949_v16  ;;  %v989_v47 = vld [vmem:[#allocation3 + $0x14] ss:$24 sps:$4 sm:$0xff]   ;;  %v982_v48 = vld [vmem:[#allocation6 + $0x128] sm:$0xff]   ;;  %v983_v49 = vld [vmem:[#allocation6 + $0x170] sm:$0xff]  }
  0x48   :  { %856 = vmatprep.subr.bf16.mxu1 %v950_v17  ;;  %v984_v50 = vld [vmem:[#allocation6 + $0x130] sm:$0xff]   ;;  %v985_v51 = vld [vmem:[#allocation6 + $0x178] sm:$0xff]   ;;  %v990_v54 = vld [vmem:[#allocation8] sm:$0xff]  }
  0x49   :  { %v986_v52 = vld [vmem:[#allocation6 + $0x138] sm:$0xff]   ;;  %v991_v56 = vld [vmem:[#allocation8 + $0x8] sm:$0xff]   ;;  %v992_v57 = vld [vmem:[#allocation8 + $0x10] sm:$0xff]  }
  0x4a   :  { %835 = vmatpush3.bf16.msra.mxu0 %v951_v18  ;;  %v987_v53 = vld [vmem:[#allocation3 + $0x10] ss:$24 sps:$4 sm:$0xff]   ;;  %v763_v13 = vld [vmem:[%s1192_s2] ss:$0 sm:$0xff]  ;;  %s1105_s2 = smov [#allocation9]  }
  0x4b   :  { %857 = vmatpush3.bf16.msra.mxu1 %v952_v19  ;;  %836 = vmatprep.subr.bf16.mxu0 %v953_v20  ;;  %s750_s26 = sshll.u32 %s1105_s2, 4  ;;  %s751_s26 = int_to_ptr.vmem [resolvable:$true] %s750_s26 }
  0x4c   :  { %858 = vmatprep.subr.bf16.mxu1 %v954_v21  ;;  %v993_v21 = vld [vmem:[#allocation8 + $0x18] sm:$0xff]   ;;  %s1068_s29 = scalar_lea.vmem %s751_s26, 256  ;;  %p1073_p11 = scmp.lt.s32.totalorder %s751_s26, %s751_s26 }
  0x4d   :  { %p1069_p10 = scmp.ne.s32.totalorder %s751_s26, %s1068_s29  ;;  %p1074_p12 = scmp.lt.s32.totalorder %s1068_s29, %s1068_s29 }
  0x4e   :  { %837 = vmatpush3.bf16.msra.mxu0 %v955_v22  ;;  %v994_v22 = vld [vmem:[#allocation8 + $0x20] sm:$0xff]  }
  0x4f   :  { %859 = vmatpush3.bf16.msra.mxu1 %v956_v23  ;;  %838 = vmatprep.subr.bf16.mxu0 %v957_v24  ;;  %v995_v23 = vld [vmem:[#allocation8 + $0x28] sm:$0xff]   ;;  %v996_v24 = vld [vmem:[#allocation8 + $0x30] sm:$0xff]   ;;  %p1075_p13 = por %p1074_p12, %p1073_p11 }
  0x50   :  { %860 = vmatprep.subr.bf16.mxu1 %v958_v25  ;;  %v997_v25 = vld [vmem:[#allocation8 + $0x38] sm:$0xff]  }
  0x51   :  { %p1076_p0 = pnand %p1075_p13, %p1069_p10 }
  0x52   :  { %839 = vmatpush3.bf16.msra.mxu0 %v959_v26 }
  0x53   :  { %861 = vmatpush3.bf16.msra.mxu1 %v960_v27  ;;  %840 = vmatprep.subr.bf16.mxu0 %v961_v28 }
  0x54   :  { %862 = vmatprep.subr.bf16.mxu1 %v962_v29 }
  0x56   :  { %841 = vmatpush3.bf16.msra.mxu0 %v963_v30 }
  0x57   :  { %863 = vmatpush3.bf16.msra.mxu1 %v964_v31  ;;  %870 = vmatprep.subr.bf16.mxu0 %v971_v36 }
  0x58   :  { %901 = vmatprep.subr.bf16.mxu1 %v1103_v55 }
  0x59   :  { %528 = vmatmul.mubr.bf16.vlgmr.msra.gmra.mrb[0].mxu0 %v965_v32 }
  0x5a   :  { %569 = vmatmul.mubr.bf16.vlgmr.msra.gmra.mrb[0].mxu1 %v968_v34  ;;  %871 = vmatpush3.bf16.msra.mxu0 %v972_v37 }
  0x5b   :  { %872 = vmatprep.subr.bf16.mxu0 %v973_v38  ;;  %609 = vmatprep.mubr.bf16.mxu0 %v989_v47 }
  0x5c   :  { %902 = vmatpush3.bf16.msra.mxu1 %v990_v54  ;;  %917 = vmatprep.mubr.msk.bf16.mxu1 %vm1104_vm0, %v1103_v55 }
  0x5d   :  { %903 = vmatprep.subr.bf16.mxu1 %v1103_v55 }
  0x5e   :  { %873 = vmatpush3.bf16.msra.mxu0 %v974_v39 }
  0x5f   :  { %874 = vmatprep.subr.bf16.mxu0 %v975_v40 }
  0x60   :  { %904 = vmatpush3.bf16.msra.mxu1 %v991_v56 }
  0x61   :  { %905 = vmatprep.subr.bf16.mxu1 %v1103_v55 }
  0x62   :  { %875 = vmatpush3.bf16.msra.mxu0 %v976_v41 }
  0x63   :  { %876 = vmatprep.subr.bf16.mxu0 %v977_v42 }
  0x64   :  { %906 = vmatpush3.bf16.msra.mxu1 %v992_v57 }
  0x65   :  { %907 = vmatprep.subr.bf16.mxu1 %v1103_v55 }
  0x66   :  { %877 = vmatpush3.bf16.msra.mxu0 %v978_v43 }
  0x67   :  { %878 = vmatprep.subr.bf16.mxu0 %v979_v44 }
  0x68   :  { %908 = vmatpush3.bf16.msra.mxu1 %v993_v21 }
  0x69   :  { %909 = vmatprep.subr.bf16.mxu1 %v1103_v55 }
  0x6a   :  { %879 = vmatpush3.bf16.msra.mxu0 %v980_v45 }
  0x6b   :  { %880 = vmatprep.subr.bf16.mxu0 %v981_v46 }
  0x6c   :  { %910 = vmatpush3.bf16.msra.mxu1 %v994_v22 }
  0x6d   :  { %911 = vmatprep.subr.bf16.mxu1 %v1103_v55 }
  0x6e   :  { %881 = vmatpush3.bf16.msra.mxu0 %v982_v48 }
  0x6f   :  { %882 = vmatprep.subr.bf16.mxu0 %v983_v49 }
  0x70   :  { %912 = vmatpush3.bf16.msra.mxu1 %v995_v23 }
  0x71   :  { %913 = vmatprep.subr.bf16.mxu1 %v1103_v55 }
  0x72   :  { %883 = vmatpush3.bf16.msra.mxu0 %v984_v50 }
  0x73   :  { %884 = vmatprep.subr.bf16.mxu0 %v985_v51 }
  0x74   :  { %914 = vmatpush3.bf16.msra.mxu1 %v996_v24 }
  0x75   :  { %915 = vmatprep.subr.bf16.mxu1 %v1103_v55 }
  0x76   :  { %885 = vmatpush3.bf16.msra.mxu0 %v986_v52 }
  0x78   :  { %916 = vmatpush3.bf16.msra.mxu1 %v997_v25 }
  0x79   :  { %610 = vmatmul.mubr.bf16.vlgmr.msra.gmra.mrb[4].mxu0 %v987_v53 }
 0x12c   :  { %v842_v58 = vpop.f32.mrb[0].mxu0 }
 0x12d   :  { %v864_v59 = vpop.f32.mrb[0].mxu1  ;;  %v843_v60 = vpop.f32.mrb[1].mxu0 }
 0x12e   :  { %v844_v61 = vadd.f32 %v843_v60, %v842_v58  ;;  %v865_v62 = vpop.f32.mrb[1].mxu1  ;;  %v845_v63 = vpop.f32.mrb[2].mxu0 }
 0x12f   :  { %v866_v0 = vadd.f32 %v865_v62, %v864_v59  ;;  %v867_v1 = vpop.f32.mrb[2].mxu1  ;;  %v846_v2 = vpop.f32.mrb[3].mxu0 }
 0x130   :  { %v847_v3 = vadd.f32 %v846_v2, %v845_v63  ;;  %v868_v4 = vpop.f32.mrb[3].mxu1 }
 0x131   :  { %v571_v5 = vadd.f32 %v866_v0, %v844_v61  ;;  %v869_v6 = vadd.f32 %v868_v4, %v867_v1 }
 0x133   :  { %v574_v7 = vadd.f32 %v869_v6, %v847_v3 }
 0x14c   :  { %v886_v8 = vpop.f32.mrb[4].mxu0 }
 0x14d   :  { %v887_v9 = vpop.f32.mrb[5].mxu0 }
 0x14e   :  { %v888_v10 = vadd.f32 %v887_v9, %v886_v8  ;;  %v889_v11 = vpop.f32.mrb[6].mxu0 }
 0x14f   :  { %v890_v12 = vpop.f32.mrb[7].mxu0 }
 0x150   :  { %v612_v14 = vadd.f32 %v888_v10, %v571_v5  ;;  %v891_v15 = vadd.f32 %v890_v12, %v889_v11 }
 0x152   :  { %v615_v16 = vadd.f32 %v891_v15, %v574_v7  ;;  %v618_v17 = vadd.f32 %v763_v13, %v612_v14 }
 0x154   :  { %v627_v18 = vmul.f32 %v618_v17, %v618_v17  ;;  %v619_v19 = vadd.f32 %v763_v13, %v615_v16 }
 0x156   :  { %629 = vadd.xlane.f32.xlu0 %v627_v18  ;;  %v628_v20 = vmul.f32 %v619_v19, %v619_v19 }
 0x15a   :  { %631 = vadd.xlane.f32.xlu0 %v628_v20 }
 0x1e3   :  { %v630_v26 = vpop.xlane.xlu0 %629 }
 0x1e4   :  { %998 = vrsqrt.f32 %v630_v26 }
 0x1e7   :  { %v632_v27 = vpop.xlane.xlu0 %631 }
 0x1e8   :  { %1000 = vrsqrt.f32 %v632_v27 }
 0x1ee   :  { %v999_v28 = vpop.eup %998 }
 0x1ef   :  { %v635_v30 = vmul.f32 %v999_v28, %v618_v17 }
 0x1f2   :  { %v1001_v29 = vpop.eup %1000 }
 0x1f3   :  { %v636_v31 = vmul.f32 %v1001_v29, %v619_v19 }
 0x1f5   :  { %v637_v32 = vpack.c.bf16 %v636_v31, %v635_v30 }
 0x1f7   :  { %918 = vmatmul.mubr.bf16.vlgmr.msra.gmra.mrb[4].mxu1 %v637_v32 }
 0x2ca   :  { %v736_v33 = vpop.f32.mrb[4].mxu1 }
 0x2cb   :  { %743 = vst [vmem:[#allocation9] sm:$0xff] %v736_v33  ;;  %v919_v34 = vpop.f32.mrb[5].mxu1 }
 0x2cc   :  { %v739_v35 = vpop.f32.mrb[6].mxu1 }
 0x2cd   :  { %744 = vst [vmem:[#allocation9 + $0x8] sm:$0xff] %v739_v35  ;;  %v920_v36 = vpop.f32.mrb[7].mxu1 }
 0x2ce   :  { %1079 = shalt.err (!%p1076_p0)
}
 0x2cf   :  { %s1080_s6 = scalar_lea.hbm %s1194_s4, 256 }
 0x2d0   :  { %p1081_p1 = scmp.ne.s32.totalorder %s1194_s4, %s1080_s6  ;;  %p1084_p2 = scmp.lt.u32.totalorder %s1080_s6, %s1194_s4 }
 0x2d2   :  { %p1086_p3 = pnand %p1084_p2, %p1081_p1 }
 0x2d4   :  { %1089 = shalt.err (!%p1086_p3)
}
 0x2d5   :  { %s1106_s11 = smov 128   ;;  %s1107_s12 = smov 8  }
 0x2d6   :  { %756 = dma.vmem_to_hbm [thread:$0]  %s751_s26, 256, %s1194_s4, [#allocation5], %s1106_s11, %s1106_s11, %s1107_s12  }
 0x2d7   :  { %1094 = dma.done.wait [#allocation5], 256  }
 0x2d8   :  { %1095 = vsyncadd [#allocation5], 4294967040 }
 0x2d9   :  { %760 = vsyncpa [#allocation4], 1 }
 0x2da   :  { %761 = vsyncpa [#allocation7], 1 }
 0x2db   :  { %762 = vsyncpa [#allocation5], 1 }

</bundles_post_ra>
